<compile_context>
chip_gen: v6e
topology: v6e:2x2x1
jax: 0.10.0
libtpu: 0.0.40
codegen_flags: <defaults>
</compile_context>

<pallas_src>
import jax
import jax.numpy as jnp
from jax.experimental import pallas as pl
from jax.experimental.pallas import tpu as pltpu


def _round_up(x, m):
    return ((x + m - 1) // m) * m


def _vmem_capacity_bytes():
    """Physical VMEM of the local chip; conservative (v7x) fallback."""
    try:
        info = pltpu.get_tpu_info()
        cap = getattr(info, "vmem_capacity_bytes", None)
        if cap:
            return int(cap)
    except Exception:
        pass
    return 64 * 2**20


def _make_ce_kernel(n_valid, row_tile, num_classes):
    inv_c = 1.0 / float(num_classes)

    def kernel(logits_ref, targets_ref, out_ref):
        i = pl.program_id(0)
        logits = logits_ref[...].astype(jnp.float32)            # (TN, C)
        t = targets_ref[...]                                     # (TN, 1) int32
        tn, c = logits.shape

        # numerically-stable log-sum-exp along the class (lane) axis
        m = jnp.max(logits, axis=-1, keepdims=True)              # (TN, 1)
        shifted = logits - m                                      # (TN, C)
        lse = jnp.log(jnp.sum(jnp.exp(shifted), axis=-1, keepdims=True))

        # fused soft-label weight: one-hot row for valid targets, uniform 1/C
        # otherwise -> a single (TN, C) lane reduce instead of two.
        col = jax.lax.broadcasted_iota(jnp.int32, (tn, c), 1)
        t_clamped = jnp.maximum(t, 0)
        w = jnp.where(t >= 0, (col == t_clamped).astype(jnp.float32), inv_c)
        s = jnp.sum(w * shifted, axis=-1, keepdims=True)          # (TN, 1)
        per_sample = lse - s                                      # (TN, 1)

        # ragged last block: discard garbage rows with a SELECT (not a
        # multiply) so inf/NaN in out-of-bounds data never reaches the sum.
        row = i * row_tile + jax.lax.broadcasted_iota(jnp.int32, (tn, 1), 0)
        per_sample = jnp.where(row < n_valid, per_sample, 0.0)

        out_ref[...] = jnp.full(out_ref.shape, jnp.sum(per_sample),
                                dtype=jnp.float32)

    return kernel


def custom_cross_entropy_loss(logits, targets, *, row_tile=None, reduction="mean"):
    """logits: (N, C) float; targets: (N,) int (negative => uniform 1/C label)."""
    if reduction not in ("mean", "sum"):
        raise NotImplementedError(
            f"reduction={reduction!r} not supported (only 'mean'/'sum')")

    n, c = logits.shape
    itemsize = jnp.dtype(logits.dtype).itemsize
    sub = 16 if itemsize < 4 else 8          # sublane packing for sub-32-bit dtypes

    vmem_cap = _vmem_capacity_bytes()
    # Per-row VMEM bytes kept live: 2x-buffered logits tile + ~4 f32 (TN,C)
    # temporaries the body materializes + lane-padded int32 targets (2x).
    per_row = 2 * c * itemsize + 4 * c * 4 + 2 * 128 * 4

    if row_tile is None:
        # Byte-targeted tile: fill a generation-aware VMEM budget (~40% of
        # physical VMEM, capped at 48 MiB) rather than a fixed row count.
        budget = min(48 * 2**20, (vmem_cap * 2) // 5)
        row_tile = min(4096, max(sub, budget // max(1, per_row)))
    row_tile = max(sub, (row_tile // sub) * sub)
    if row_tile >= n:
        row_tile = n          # single block; block dim == full dim is always legal
    num_tiles = -(-n // row_tile)

    targets2d = targets.astype(jnp.int32).reshape(n, 1)

    vmem_need = row_tile * per_row + 4 * 128 * 4
    vmem_limit = int(min((vmem_cap * 3) // 4,
                         max(32 * 2**20, vmem_need + 8 * 2**20)))

    cost = pl.CostEstimate(
        flops=5 * n * c,
        transcendentals=n * c + n,
        bytes_accessed=n * c * itemsize + n * 4 + num_tiles * 128 * 4,
    )

    out = pl.pallas_call(
        _make_ce_kernel(n, row_tile, c),
        out_shape=jax.ShapeDtypeStruct((num_tiles, 1, 128), jnp.float32),
        grid=(num_tiles,),
        in_specs=[
            pl.BlockSpec((row_tile, c), lambda i: (i, 0)),
            pl.BlockSpec((row_tile, 1), lambda i: (i, 0)),
        ],
        out_specs=pl.BlockSpec((1, 1, 128), lambda i: (i, 0, 0)),
        compiler_params=pltpu.CompilerParams(
            dimension_semantics=("parallel",),
            vmem_limit_bytes=vmem_limit,
        ),
        cost_estimate=cost,
    )(logits, targets2d)

    total = jnp.sum(out[:, 0, 0])
    if reduction == "sum":
        return total
    # 'mean' over the GLOBAL batch size
    return total / jnp.float32(n)


def _reference(logits, targets, reduction="mean"):
    n, c = logits.shape
    logp = jax.nn.log_softmax(logits.astype(jnp.float32), axis=-1)
    one_hot = jax.nn.one_hot(jnp.maximum(targets, 0), c, dtype=jnp.float32)
    labels = jnp.where(targets[:, None] >= 0, one_hot, 1.0 / c)
    per_sample = -jnp.sum(labels * logp, axis=-1)
    return jnp.sum(per_sample) if reduction == "sum" else jnp.mean(per_sample)


if __name__ == "__main__":
    key = jax.random.PRNGKey(0)
    k1, k2, k3, k4 = jax.random.split(key, 4)

    # Case 1: single tile, f32, mix of valid and negative ("unknown") targets.
    N, C = 8, 32
    logits = jax.random.normal(k1, (N, C), dtype=jnp.float32)
    targets = jax.random.randint(k2, (N,), minval=-1, maxval=C, dtype=jnp.int32)
    loss = custom_cross_entropy_loss(logits, targets)
    jax.block_until_ready(loss)
    ref = _reference(logits, targets)
    assert jnp.allclose(loss, ref, atol=1e-5, rtol=1e-5), (loss, ref)

    # Case 2: multi-tile RAGGED path (N not a multiple of the tile, no pad).
    N2, C2 = 20, 32
    logits2 = jax.random.normal(k3, (N2, C2), dtype=jnp.float32)
    targets2 = jax.random.randint(k4, (N2,), minval=-2, maxval=C2, dtype=jnp.int32)
    loss2 = custom_cross_entropy_loss(logits2, targets2, row_tile=8)
    jax.block_until_ready(loss2)
    ref2 = _reference(logits2, targets2)
    assert jnp.allclose(loss2, ref2, atol=1e-5, rtol=1e-5), (loss2, ref2)

    # Case 3: reduction='sum' with auto tile sizing (single full-batch block).
    loss3 = custom_cross_entropy_loss(logits2, targets2, reduction="sum")
    jax.block_until_ready(loss3)
    ref3 = _reference(logits2, targets2, reduction="sum")
    assert jnp.allclose(loss3, ref3, atol=1e-4, rtol=1e-5), (loss3, ref3)

    print("KERNEL_OK")
</pallas_src>

<mosaic_0001>
module attributes {stable_mosaic.version = 11 : i64} {
  func.func @kernel(%arg0: i32, %arg1: memref<8x32xf32, #tpu.memory_space<vmem>>, %arg2: memref<8x1xi32, #tpu.memory_space<vmem>>, %arg3: memref<1x1x128xf32, #tpu.memory_space<vmem>>) attributes {dimension_semantics = [#tpu.dimension_semantics<parallel>], iteration_bounds = array<i64: 1>, scalar_prefetch = 0 : i64, scratch_operands = 0 : i64, tpu.core_type = #tpu.core_type<tc>, window_params = [{transform_indices = @transform_0, window_bounds = array<i64: 8, 32>}, {transform_indices = @transform_1, window_bounds = array<i64: 8, 1>}, {transform_indices = @transform_2, window_bounds = array<i64: 1, 1, 128>}]} {
    %c0 = arith.constant 0 : index
    %c0_0 = arith.constant 0 : index
    %0 = vector.load %arg1[%c0, %c0_0] : memref<8x32xf32, #tpu.memory_space<vmem>>, vector<8x32xf32>
    %c0_1 = arith.constant 0 : index
    %c0_2 = arith.constant 0 : index
    %1 = vector.load %arg2[%c0_1, %c0_2] : memref<8x1xi32, #tpu.memory_space<vmem>>, vector<8x1xi32>
    %cst = arith.constant dense<0xFF800000> : vector<8xf32>
    %2 = vector.multi_reduction <maximumf>, %0, %cst [1] : vector<8x32xf32> to vector<8xf32>
    %3 = vector.shape_cast %2 : vector<8xf32> to vector<8x1xf32>
    %4 = vector.broadcast %3 : vector<8x1xf32> to vector<8x32xf32>
    %5 = arith.subf %0, %4 : vector<8x32xf32>
    %6 = math.exp %5 : vector<8x32xf32>
    %cst_3 = arith.constant dense<0.000000e+00> : vector<8xf32>
    %7 = vector.multi_reduction <add>, %6, %cst_3 [1] : vector<8x32xf32> to vector<8xf32>
    %8 = vector.shape_cast %7 : vector<8xf32> to vector<8x1xf32>
    %9 = math.log %8 : vector<8x1xf32>
    %10 = tpu.iota {dimensions = array<i32: 1>} : vector<8x32xi32>
    %c0_i32 = arith.constant 0 : i32
    %11 = vector.broadcast %c0_i32 : i32 to vector<8x1xi32>
    %12 = arith.maxsi %1, %11 : vector<8x1xi32>
    %c0_i32_4 = arith.constant 0 : i32
    %13 = vector.broadcast %c0_i32_4 : i32 to vector<8x1xi32>
    %14 = arith.cmpi sge, %1, %13 : vector<8x1xi32>
    %15 = vector.broadcast %12 : vector<8x1xi32> to vector<8x32xi32>
    %16 = arith.cmpi eq, %10, %15 : vector<8x32xi32>
    %17 = arith.extui %16 : vector<8x32xi1> to vector<8x32xi32>
    %18 = arith.sitofp %17 : vector<8x32xi32> to vector<8x32xf32>
    %cst_5 = arith.constant 3.125000e-02 : f32
    %19 = vector.shape_cast %14 : vector<8x1xi1> to vector<8x1xi1>
    %20 = vector.broadcast %19 : vector<8x1xi1> to vector<8x32xi1>
    %21 = vector.broadcast %cst_5 : f32 to vector<8x32xf32>
    %22 = arith.select %20, %18, %21 : vector<8x32xi1>, vector<8x32xf32>
    %23 = arith.mulf %22, %5 : vector<8x32xf32>
    %cst_6 = arith.constant dense<0.000000e+00> : vector<8xf32>
    %24 = vector.multi_reduction <add>, %23, %cst_6 [1] : vector<8x32xf32> to vector<8xf32>
    %25 = vector.shape_cast %24 : vector<8xf32> to vector<8x1xf32>
    %26 = arith.subf %9, %25 : vector<8x1xf32>
    %c8_i32 = arith.constant 8 : i32
    %27 = arith.muli %arg0, %c8_i32 : i32
    %28 = tpu.iota {dimensions = array<i32: 0>} : vector<8x1xi32>
    %29 = vector.broadcast %27 : i32 to vector<8x1xi32>
    %30 = arith.addi %29, %28 : vector<8x1xi32>
    %c8_i32_7 = arith.constant 8 : i32
    %31 = vector.broadcast %c8_i32_7 : i32 to vector<8x1xi32>
    %32 = arith.cmpi slt, %30, %31 : vector<8x1xi32>
    %cst_8 = arith.constant 0.000000e+00 : f32
    %33 = vector.broadcast %cst_8 : f32 to vector<8x1xf32>
    %34 = arith.select %32, %26, %33 : vector<8x1xi1>, vector<8x1xf32>
    %35 = vector.shape_cast %34 : vector<8x1xf32> to vector<1x8x1xf32>
    %cst_9 = arith.constant dense<0.000000e+00> : vector<1xf32>
    %36 = vector.multi_reduction <add>, %35, %cst_9 [1, 2] : vector<1x8x1xf32> to vector<1xf32>
    %37 = vector.shape_cast %36 : vector<1xf32> to vector<1x1x1xf32>
    %38 = vector.extract %37[0, 0, 0] : f32 from vector<1x1x1xf32>
    %39 = vector.broadcast %38 : f32 to vector<1x1x128xf32>
    %c0_10 = arith.constant 0 : index
    %c0_11 = arith.constant 0 : index
    %c0_12 = arith.constant 0 : index
    %40 = vector.load %arg3[%c0_10, %c0_11, %c0_12] : memref<1x1x128xf32, #tpu.memory_space<vmem>>, vector<1x1x128xf32>
    tpu.vector_store %arg3[%c0_10, %c0_11, %c0_12], %39 {strides = array<i32>} : memref<1x1x128xf32, #tpu.memory_space<vmem>>, vector<1x1x128xf32>,
    return
  }
  func.func @transform_0(%arg0: i32) -> (i32, i32) {
    %c0_i32 = arith.constant 0 : i32
    %c0_i32_0 = arith.constant 0 : i32
    return %arg0, %c0_i32 : i32, i32
  }
  func.func @transform_1(%arg0: i32) -> (i32, i32) {
    %c0_i32 = arith.constant 0 : i32
    %c0_i32_0 = arith.constant 0 : i32
    return %arg0, %c0_i32 : i32, i32
  }
  func.func @transform_2(%arg0: i32) -> (i32, i32, i32) {
    %c0_i32 = arith.constant 0 : i32
    %c0_i32_0 = arith.constant 0 : i32
    %c0_i32_1 = arith.constant 0 : i32
    return %arg0, %c0_i32, %c0_i32_0 : i32, i32, i32
  }
}

</mosaic_0001>

<bundles_post_ra>
// kernel: tpu_custom_call.1
= control target key start
LH: loop header
LB: loop body
LE: loop exit
PB: predicated region body
PF: predicated region fallthrough
CT: control target
= control target key end

     0   :  { %vm14_vm0 = vcmask 261120   ;;  %s146_s0 = inlined_call_operand.vmem [shape: f32[8,32], index: 0, kind: input, shape index: {}]   ;;  %s147_s1 = inlined_call_operand.vmem [shape: s32[8,1], index: 1, kind: input, shape index: {}]   ;;  %s148_s2 = inlined_call_operand.hbm [shape: f32[1,1,128], index: 2, kind: output, shape index: {}]  }
   0x1   :  { %v12_v0 = vld [vmem:[%s146_s0] sm:$0xff] }
   0x2   :  { %v13_v1 = vld [vmem:[%s147_s1] sm:$0xff] }
   0x3   :  { %7 = vsyncpa [#allocation3], 0  ;;  %v15_v2 = vsel %vm14_vm0, %v12_v0, -inf  ;;  %v116_v3 = vmov 0   ;;  %vm30_vm1 = vcmp.ge.s32.totalorder %v13_v1, 0  ;;  %vm28_vm2 = vcmp.gt.s32.totalorder %v13_v1, 0 }
   0x4   :  { %88 = vset.pattern.permute.xlu0 %v116_v3  ;;  %89 = vset.pattern.permute.xlu1 %v116_v3  ;;  %v37_v4 = vsel %vm30_vm1, 1, %v116_v3  ;;  %v29_v5 = vsel %vm28_vm2, %v13_v1, 0  ;;  %v26_v8 = vlaneseq  ;;  %v117_v13 = vmov 0.0   ;;  %s118_s0 = smov [#allocation2]  }
   0x5   :  { %16 = vmax.xlane.f32.xlu0 %v15_v2  ;;  %39 = vperm.xlu1 %89, %v37_v4   ;;  %vm55_vm5 = vcmask 7168   ;;  %s74_s1 = sshll.u32 %s118_s0, 4  ;;  %s75_s1 = int_to_ptr.vmem [resolvable:$true] %s74_s1 }
   0x6   :  { %v27_v10 = vand.u32 127, %v26_v8  ;;  %s94_s14 = scalar_lea.vmem %s75_s1, 16  ;;  %s98_s15 = scalar_lea.vmem %s75_s1, 32 }
   0x7   :  { %p95_p0 = scmp.ne.s32.totalorder %s75_s1, %s94_s14  ;;  %p99_p1 = scmp.lt.s32.totalorder %s75_s1, %s75_s1 }
   0x8   :  { %p100_p2 = scmp.lt.s32.totalorder %s98_s15, %s94_s14 }
   0xa   :  { %p101_p3 = por %p100_p2, %p99_p1 }
   0xc   :  { %p102_p4 = pnand %p101_p3, %p95_p0 }
  0x1b   :  { %32 = vperm.xlu0 %88, %v29_v5  }
  0x80   :  { %v40_v12 = vpop.permute.xlu1 %39 }
  0x81   :  { %vm41_vm4 = vcmp.eq.s32.totalorder %v40_v12, 1 }
  0x8e   :  { %v17_v6 = vpop.xlane.xlu0 %16 }
  0x8f   :  { %v18_v7 = vsub.f32 %v12_v0, %v17_v6 }
  0x91   :  { %v19_v9 = vmul.f32 1.442695, %v18_v7 }
  0x93   :  { %90 = vpow2.f32 %v19_v9 }
  0x96   :  { %v33_v11 = vpop.permute.xlu0 %32 }
  0x97   :  { %vm34_vm3 = vcmp.eq.s32.totalorder %v27_v10, %v33_v11 }
  0x98   :  { %v82_v14 = vsel %vm34_vm3, 1.0, %v117_v13 }
  0x99   :  { %v42_v15 = vsel %vm41_vm4, %v82_v14, 0.03125 }
  0x9a   :  { %v43_v18 = vmul.f32 %v42_v15, %v18_v7 }
  0x9c   :  { %v44_v19 = vsel %vm14_vm0, %v43_v18, 0.0 }
  0xa0   :  { %v91_v16 = vpop.eup %90 }
  0xa1   :  { %v21_v17 = vsel %vm14_vm0, %v91_v16, 0.0 }
  0xa2   :  { %22 = vadd.xlane.f32.xlu1 %v21_v17 }
  0xa6   :  { %45 = vadd.xlane.f32.xlu1 %v44_v19 }
 0x12b   :  { %v23_v20 = vpop.xlane.xlu1 %22 }
 0x12c   :  { %92 = vlog2.f32 %v23_v20 }
 0x12f   :  { %v46_v23 = vpop.xlane.xlu1 %45 }
 0x139   :  { %v93_v21 = vpop.eup %92 }
 0x13a   :  { %v25_v22 = vmul.f32 0.6931472, %v93_v21 }
 0x13c   :  { %v47_v24 = vsub.f32 %v25_v22, %v46_v23 }
 0x13e   :  { %v56_v25 = vsel %vm55_vm5, %v47_v24, 0.0 }
 0x13f   :  { %57 = vadd.xlane.f32.xlu1 %v56_v25 }
 0x1c8   :  { %v58_v26 = vpop.xlane.xlu1 %57 }
 0x1c9   :  { %v59_v27 = vrot.slane %v58_v26, 4 }
 0x1cb   :  { %v60_v28 = vadd.f32 %v59_v27, %v58_v26 }
 0x1cd   :  { %v61_v29 = vrot.slane %v60_v28, 2 }
 0x1cf   :  { %v62_v30 = vadd.f32 %v61_v29, %v60_v28 }
 0x1d1   :  { %v63_v31 = vrot.slane %v62_v30, 1 }
 0x1d3   :  { %v64_v32 = vadd.f32 %v63_v31, %v62_v30 }
 0x1d5   :  { %83 = vpush %v64_v32 }
 0x206   :  { %s84_s13 = spop %83 }
 0x207   :  { %v66_v33 = vstv %s84_s13 }
 0x208   :  { %67 = vst [vmem:[#allocation2] sm:$0x1] %v66_v33 }
 0x209   :  { %105 = shalt.err (!%p102_p4)
}
 0x20a   :  { %77 = dma.vmem_to_hbm [thread:$0]  %s75_s1, 16, %s148_s2, [#allocation3]  }
 0x20b   :  { %114 = dma.done.wait [#allocation3], 16  }
 0x20c   :  { %115 = vsyncadd [#allocation3], 4294967280 }
 0x20d   :  { %81 = vsyncpa [#allocation3], 1 }

</bundles_post_ra>
